<compile_context>
chip_gen: v7x
topology: tpu7x:2x2x1
jax: 0.10.0
libtpu: 0.0.40
codegen_flags: <defaults>
</compile_context>

<pallas_src>
import functools

import jax
import jax.numpy as jnp
from jax.experimental import pallas as pl
from jax.experimental.pallas import tpu as pltpu


def _perm_matrix(w, size, dtype):
    """(size^2*W, size^2*W) 0/1 matrix P with
    P[(s1*size + s2)*W + wi, s1*size*W + wi*size + s2] = 1."""
    k = size * size * w
    rows = jnp.arange(k, dtype=jnp.int32)
    grp = rows // w
    wi = rows % w
    s1 = grp // size
    s2 = grp % size
    target = s1 * (size * w) + wi * size + s2
    cols = jnp.arange(k, dtype=jnp.int32)
    return (cols[None, :] == target[:, None]).astype(dtype)


def _pick_h_tile(h, c, w, itemsize, budget_bytes=4 * 1024 * 1024):
    """Largest H tile (a multiple of 8 dividing H, or full H) whose per-step
    VMEM footprint (double-buffered in/out blocks + packed LHS value + f32
    matmul result) fits a conservative budget on all TPU generations."""
    bytes_per_row = c * w * (5 * itemsize + 8)
    max_rows = max(8, budget_bytes // max(bytes_per_row, 1))
    if h <= max_rows:
        return h
    th = (max_rows // 8) * 8
    while th >= 8:
        if h % th == 0:
            return th
        th -= 8
    return h  # no suitable divisor; fall back to the full H dimension


def depth_to_space_kernel(x_ref, p_ref, o_ref, *, size):
    _, c, th, w = x_ref.shape
    g = size * size
    out_c = c // g

    x = x_ref[0]  # (C, TH, W)

    # Pack the size^2 channel groups side by side along the lane axis:
    #   v[oc*TH + h, gi*W + wi] = x[gi*out_c + oc, h, wi]
    groups = [
        x[i * out_c:(i + 1) * out_c].reshape(out_c * th, w) for i in range(g)
    ]
    v = jnp.concatenate(groups, axis=1)  # (out_c*TH, size^2*W)

    # Single permutation matmul performs the whole lane interleave for the
    # tile: output column j = s1*size*W + wi*size + s2 copies row
    # k = (s1*size + s2)*W + wi.  Exact: one x * 1.0 product per output.
    t = jnp.dot(v, p_ref[...], preferred_element_type=jnp.float32)

    o_ref[0] = t.reshape(out_c, th, g * w).astype(o_ref.dtype)


def depth_to_space(x, size=2):
    b, c, h, w = x.shape
    g = size * size
    assert c % g == 0, "channels must be divisible by size**2"
    out_c = c // g
    k = g * w

    # TODO(synk): integer dtypes would need a non-MXU copy path; this kernel
    # targets the float dtypes (f32/bf16) the model actually uses.
    perm = _perm_matrix(w, size, x.dtype)

    th = _pick_h_tile(h, c, w, x.dtype.itemsize)
    grid = (b, h // th)

    kernel = functools.partial(depth_to_space_kernel, size=size)
    # The kernel writes (B, out_c, H, size^2*W); its row-major layout is
    # identical to (B, out_c, size*H, size*W), so the final reshape is free.
    out = pl.pallas_call(
        kernel,
        out_shape=jax.ShapeDtypeStruct((b, out_c, h, k), x.dtype),
        grid=grid,
        in_specs=[
            pl.BlockSpec((1, c, th, w), lambda bi, hi: (bi, 0, hi, 0)),
            pl.BlockSpec((k, k), lambda bi, hi: (0, 0)),  # permutation matrix
        ],
        out_specs=pl.BlockSpec((1, out_c, th, k), lambda bi, hi: (bi, 0, hi, 0)),
        compiler_params=pltpu.CompilerParams(
            dimension_semantics=("parallel", "parallel"),
            vmem_limit_bytes=32 * 1024 * 1024,
        ),
    )(x, perm)
    return out.reshape(b, out_c, size * h, size * w)


def _ref_depth_to_space(x, size=2):
    b, c, h, w = x.shape
    out_c = c // (size * size)
    x = x.reshape(b, size, size, out_c, h, w)
    x = jnp.transpose(x, (0, 3, 4, 1, 5, 2))
    return x.reshape(b, out_c, size * h, size * w)


if __name__ == "__main__":
    key = jax.random.PRNGKey(0)

    # Main test: B=2, C=8 (-> out_c=2), 16x16 spatial, size=2 (NCHW like the module).
    x = jax.random.normal(key, (2, 8, 16, 16), dtype=jnp.float32)
    out = jax.block_until_ready(depth_to_space(x, size=2))
    ref = _ref_depth_to_space(x, size=2)
    assert out.shape == ref.shape == (2, 2, 32, 32), (out.shape, ref.shape)
    assert out.dtype == x.dtype
    assert jnp.allclose(out, ref), "f32 mismatch vs reference depth_to_space"

    # bf16 path (no upcast of stored data; permutation copies stay exact,
    # output lane width is 128 -> lane-dense stores).
    xb = jax.random.normal(jax.random.PRNGKey(1), (1, 16, 16, 32), dtype=jnp.bfloat16)
    outb = jax.block_until_ready(depth_to_space(xb, size=2))
    refb = _ref_depth_to_space(xb, size=2)
    assert outb.shape == refb.shape == (1, 4, 32, 64), (outb.shape, refb.shape)
    assert outb.dtype == xb.dtype
    assert jnp.array_equal(outb, refb), "bf16 mismatch vs reference depth_to_space"

    print("KERNEL_OK")
</pallas_src>

<mosaic_0001>
module attributes {stable_mosaic.version = 11 : i64} {
  func.func @depth_to_space_kernel(%arg0: i32, %arg1: i32, %arg2: memref<1x8x16x16xf32, #tpu.memory_space<vmem>>, %arg3: memref<64x64xf32, #tpu.memory_space<vmem>>, %arg4: memref<1x2x16x64xf32, #tpu.memory_space<vmem>>) attributes {dimension_semantics = [#tpu.dimension_semantics<parallel>, #tpu.dimension_semantics<parallel>], iteration_bounds = array<i64: 2, 1>, scalar_prefetch = 0 : i64, scratch_operands = 0 : i64, tpu.core_type = #tpu.core_type<tc>, window_params = [{transform_indices = @transform_0, window_bounds = array<i64: 1, 8, 16, 16>}, {pipeline_mode = #tpu.pipeline_mode<synchronous>, transform_indices = @transform_1, window_bounds = array<i64: 64, 64>}, {transform_indices = @transform_2, window_bounds = array<i64: 1, 2, 16, 64>}]} {
    %c0 = arith.constant 0 : index
    %c0_0 = arith.constant 0 : index
    %c0_1 = arith.constant 0 : index
    %c0_2 = arith.constant 0 : index
    %0 = vector.load %arg2[%c0, %c0_0, %c0_1, %c0_2] : memref<1x8x16x16xf32, #tpu.memory_space<vmem>>, vector<1x8x16x16xf32>
    %1 = vector.shape_cast %0 : vector<1x8x16x16xf32> to vector<8x16x16xf32>
    %2 = vector.extract_strided_slice %1 {offsets = [0, 0, 0], sizes = [2, 16, 16], strides = [1, 1, 1]} : vector<8x16x16xf32> to vector<2x16x16xf32>
    %3 = vector.shape_cast %2 : vector<2x16x16xf32> to vector<32x16xf32>
    %4 = vector.extract_strided_slice %1 {offsets = [2, 0, 0], sizes = [2, 16, 16], strides = [1, 1, 1]} : vector<8x16x16xf32> to vector<2x16x16xf32>
    %5 = vector.shape_cast %4 : vector<2x16x16xf32> to vector<32x16xf32>
    %6 = vector.extract_strided_slice %1 {offsets = [4, 0, 0], sizes = [2, 16, 16], strides = [1, 1, 1]} : vector<8x16x16xf32> to vector<2x16x16xf32>
    %7 = vector.shape_cast %6 : vector<2x16x16xf32> to vector<32x16xf32>
    %8 = vector.extract_strided_slice %1 {offsets = [6, 0, 0], sizes = [2, 16, 16], strides = [1, 1, 1]} : vector<8x16x16xf32> to vector<2x16x16xf32>
    %9 = vector.shape_cast %8 : vector<2x16x16xf32> to vector<32x16xf32>
    %10 = tpu.concatenate %3, %5, %7, %9 in 1 : vector<32x16xf32>, vector<32x16xf32>, vector<32x16xf32>, vector<32x16xf32> -> vector<32x64xf32>
    %c0_3 = arith.constant 0 : index
    %c0_4 = arith.constant 0 : index
    %11 = vector.load %arg3[%c0_3, %c0_4] : memref<64x64xf32, #tpu.memory_space<vmem>>, vector<64x64xf32>
    %cst = arith.constant dense<0.000000e+00> : vector<32x64xf32>
    %12 = tpu.matmul %10, %11, %cst {dimension_numbers = #tpu.dot_dimension_numbers<[1], [0], [0], [1], [0, 0, 1, 1], [], []>} : vector<32x64xf32>, vector<64x64xf32>, vector<32x64xf32> -> vector<32x64xf32>
    %13 = vector.shape_cast %12 : vector<32x64xf32> to vector<2x16x64xf32>
    %c0_5 = arith.constant 0 : index
    %c0_6 = arith.constant 0 : index
    %c0_7 = arith.constant 0 : index
    %c0_8 = arith.constant 0 : index
    %14 = vector.load %arg4[%c0_5, %c0_6, %c0_7, %c0_8] : memref<1x2x16x64xf32, #tpu.memory_space<vmem>>, vector<1x2x16x64xf32>
    %15 = vector.shape_cast %14 : vector<1x2x16x64xf32> to vector<2x16x64xf32>
    %16 = vector.shape_cast %13 : vector<2x16x64xf32> to vector<1x2x16x64xf32>
    tpu.vector_store %arg4[%c0_5, %c0_6, %c0_7, %c0_8], %16 {strides = array<i32>} : memref<1x2x16x64xf32, #tpu.memory_space<vmem>>, vector<1x2x16x64xf32>,
    return
  }
  func.func @transform_0(%arg0: i32, %arg1: i32) -> (i32, i32, i32, i32) {
    %c0_i32 = arith.constant 0 : i32
    %c0_i32_0 = arith.constant 0 : i32
    %c0_i32_1 = arith.constant 0 : i32
    return %arg0, %c0_i32, %arg1, %c0_i32_0 : i32, i32, i32, i32
  }
  func.func @transform_1(%arg0: i32, %arg1: i32) -> (i32, i32) {
    %c0_i32 = arith.constant 0 : i32
    %c0_i32_0 = arith.constant 0 : i32
    %c0_i32_1 = arith.constant 0 : i32
    return %c0_i32, %c0_i32_0 : i32, i32
  }
  func.func @transform_2(%arg0: i32, %arg1: i32) -> (i32, i32, i32, i32) {
    %c0_i32 = arith.constant 0 : i32
    %c0_i32_0 = arith.constant 0 : i32
    %c0_i32_1 = arith.constant 0 : i32
    return %arg0, %c0_i32, %arg1, %c0_i32_0 : i32, i32, i32, i32
  }
}

</mosaic_0001>

<bundles_post_ra>
// kernel: tpu_custom_call.1
= control target key start
LH: loop header
LB: loop body
LE: loop exit
PB: predicated region body
PF: predicated region fallthrough
CT: control target
= control target key end

     0   :  { %7 = vsyncpa [#allocation3], 0  ;;  %s1095_s0 = inlined_call_operand.hbm [shape: f32[2,8,16,16], index: 0, kind: input, shape index: {}]   ;;  %s1096_s1 = inlined_call_operand.hbm [shape: f32[64,64], index: 1, kind: input, shape index: {}]   ;;  %s1097_s2 = inlined_call_operand.hbm [shape: f32[2,2,16,64], index: 2, kind: output, shape index: {}]  }
   0x1   :  { %9 = vsyncpa [#allocation3 + $0x1], 0 }
   0x2   :  { %10 = vsyncpa [#allocation6], 0 }
   0x3   :  { %11 = vsyncpa [#allocation4], 0 }
   0x4   :  { %13 = vsyncpa [#allocation4 + $0x1], 0  ;;  %s831_s9 = smov 0   ;;  %s833_s10 = smov 0  }
   0x5   :  { %s835_s11 = smov 0   ;;  %s837_s12 = smov 0  }
   0x6   :  { %s839_s13 = smov 0   ;;  %s841_s14 = smov 0  }
   0x7 LB: > { %s499_s15 = sadd.s32 4294967295, %s804_s14   ;;  %s500_s16 = sadd.s32 4294967294, %s804_s14   ;;  %s804_s14 = sphi %s841_s14, %s19_s14   ;;  %s800_s13 = sphi %s839_s13, %s1121_s13   ;;  %s796_s12 = sphi %s837_s12, %s1120_s12   ;;  %s792_s11 = sphi %s835_s11, %s1119_s11   ;;  %s788_s10 = sphi %s833_s10, %s1118_s10   ;;  %s784_s9 = sphi %s831_s9, %s1117_s9  }
   0x8   : > { %p53_p0 = scmp.ne.s32.totalorder %s788_s10, %s784_s9  ;;  %p865_p1 = scmp.eq.s32.totalorder %s499_s15, 0 }
   0x9   : > { %p869_p2 = scmp.eq.s32.totalorder %s499_s15, 1  ;;  %p106_p3 = scmp.eq.s32.totalorder %s500_s16, 1 }
   0xa   : > { %s1102_s17 = scalar_select %p865_p1, 1, 0 }
   0xb   : > { %s1103_s18 = scalar_select %p869_p2, 1, 0 }
   0xc   : > { %p875_p4 = por %p865_p1, %p53_p0  ;;  %p501_p5 = scmp.ge.s32.totalorder %s804_s14, 1 }
   0xd   : > { %p880_p6 = por %p106_p3, %p53_p0  ;;  %p113_p7 = scmp.lt.s32.totalorder %s804_s14, 3 }
   0xe   : > { %s1104_s19 = scalar_select %p875_p4, 1, 0 }
   0xf   : > { %s1105_s20 = scalar_select %p880_p6, 1, 0 }
  0x10   : > { %p885_p8 = pnand %p501_p5, %p113_p7  ;;  %s806_s22 = smov [#allocation5]  }
  0x11   : > { %s125_s23 = sshll.u32 %s806_s22, 4  ;;  %s31_s25 = sadd.s32 1, %s800_s13  ;;  %s126_s23 = int_to_ptr.vmem [resolvable:$true] %s125_s23 }
  0x12   : > { %s1106_s21 = scalar_select %p885_p8, 1, 0 }
  0x13   : > { %p588_p9 = pneg %p885_p8  ;;  %s660_s28 = scalar_lea.hbm %s1096_s1, 1024 }
  0x14   : > { %p661_p12 = scmp.ne.s32.totalorder %s1096_s1, %s660_s28  ;;  %p667_p5 = scmp.lt.u32.totalorder %s660_s28, %s1096_s1 }
  0x15   : > { %p894_p11 = pnand %p588_p9, %p865_p1 }
  0x17   : > { %p662_p13 = pneg %p894_p11 }
  0x19   : > { %p663_p0 = pnand %p662_p13, %p661_p12 }
  0x1b   : > { %p664_p3 = pneg %p663_p0 }
  0x1d   : > { %p669_p7 = pnand %p667_p5, %p664_p3 }
  0x1f   : > { %672 = shalt.err (!%p669_p7)
}
  0x20   : > { %s673_s5 = scalar_lea.vmem %s126_s23, 1024  ;;  %p681_p1 = scmp.lt.s32.totalorder %s126_s23, %s126_s23 }
  0x21   : > { %p674_p9 = scmp.ne.s32.totalorder %s126_s23, %s673_s5  ;;  %p682_p4 = scmp.lt.s32.totalorder %s673_s5, %s673_s5 }
  0x23   : > { %p676_p10 = pnand %p674_p9, %p662_p13  ;;  %p683_p8 = por %p682_p4, %p681_p1 }
  0x25   : > { %p677_p6 = pneg %p676_p10 }
  0x27   : > { %p684_p2 = pnand %p683_p8, %p677_p6 }
  0x29   : > { %687 = shalt.err (!%p684_p2)
}
  0x2a   : > { %s807_s6 = smov 128   ;;  %s808_s7 = smov 8  }
  0x2b   : > { %591 = dma.hbm_to_vmem [thread:$0]  (!%p894_p11), %s1096_s1, 1024, %s126_s23, [#allocation6], %s807_s6, %s807_s6, %s808_s7  }
  0x2c   : > { %p33_p1 = scmp.ge.s32.totalorder %s31_s25, 2  ;;  %s40_s16 = sadd.s32 1, %s792_s11 }
  0x2d   : > { %p47_p2 = scmp.ne.s32.totalorder %s792_s11, %s788_s10  ;;  %p48_p4 = scmp.eq.s32.totalorder %s804_s14, 0 }
  0x2e   : > { %s1123_s25 = smov (%p33_p1, %s31_s25), 0  ;;  %p1109_p8 = scmp.ne.s32.totalorder %s1103_s18, 0 }
  0x2f   : > { %p924_p6 = por %p48_p4, %p47_p2  ;;  %s35_s26 = ssub.s32 %s800_s13, %s1123_s25 }
  0x30   : > { %p930_p10 = por %p1109_p8, %p47_p2  ;;  %p601_p12 = scmp.lt.s32.totalorder %s804_s14, 2 }
  0x31   : > { %p38_p11 = scmp.eq.s32.totalorder %s35_s26, 0  ;;  %s139_s23 = sand.u32 1, %s792_s11  }
  0x32   : > { %s504_s27 = sshll.u32 %s139_s23, 7  ;;  %s520_s29 = sshll.u32 %s800_s13, 11 }
  0x33   : > { %s939_s28 = scalar_select %p38_p11, %s792_s11, %s40_s16  }
  0x34   : > { %s945_s4 = scalar_lea.hbm %s1095_s0, %s520_s29  ;;  %s143_s18 = scalar_lea.vmem [#allocation2], %s504_s27 }
  0x35   : > { %s152_s5 = sshll.u32 %s143_s18, 4  ;;  %p951_p13 = pnand %p601_p12, %p924_p6  ;;  %s947_s5 = int_to_ptr.vmem [resolvable:$true] %s152_s5 }
  0x36   : > { %s955_s15 = scalar_lea.sflag [#allocation3], %s139_s23  ;;  %s688_s16 = scalar_lea.hbm %s945_s4, 2048 }
  0x37   : > { %p689_p0 = scmp.ne.s32.totalorder %s945_s4, %s688_s16  ;;  %p690_p3 = pneg %p951_p13 }
  0x38   : > { %s693_s22 = scalar_lea.hbm %s1095_s0, 4096  ;;  %p694_p9 = scmp.lt.u32.totalorder %s945_s4, %s1095_s0 }
  0x39   : > { %p691_p5 = pnand %p690_p3, %p689_p0  ;;  %p695_p1 = scmp.lt.u32.totalorder %s693_s22, %s688_s16 }
  0x3a   : > { %p697_p4 = scmp.lt.u32.totalorder %s688_s16, %s945_s4 }
  0x3b   : > { %p692_p7 = pneg %p691_p5  ;;  %p696_p2 = por %p695_p1, %p694_p9 }
  0x3d   : > { %p698_p6 = por %p697_p4, %p696_p2 }
  0x3f   : > { %p699_p8 = pnand %p698_p6, %p692_p7 }
  0x41   : > { %702 = shalt.err (!%p699_p8)
}
  0x42   : > { %s703_s23 = scalar_lea.vmem %s947_s5, 2048  ;;  %s809_s3 = smov [#allocation2]  }
  0x43   : > { %p704_p12 = scmp.ne.s32.totalorder %s947_s5, %s703_s23  ;;  %s708_s18 = sshll.u32 %s809_s3, 4  ;;  %s709_s18 = int_to_ptr.vmem [resolvable:$false] %s708_s18 }
  0x44   : > { %s710_s26 = scalar_lea.vmem %s709_s18, 4096  ;;  %p711_p5 = scmp.lt.s32.totalorder %s947_s5, %s709_s18 }
  0x45   : > { %p706_p11 = pnand %p704_p12, %p690_p3  ;;  %p712_p9 = scmp.lt.s32.totalorder %s710_s26, %s703_s23 }
  0x47   : > { %p707_p0 = pneg %p706_p11  ;;  %p713_p1 = por %p712_p9, %p711_p5 }
  0x49   : > { %p714_p2 = pnand %p713_p1, %p707_p0 }
  0x4b   : > { %717 = shalt.err (!%p714_p2)
}
  0x4c   : > { %595 = dma.hbm_to_vmem [thread:$0]  (!%p951_p13), %s945_s4, 2048, %s947_s5, %s955_s15, %s807_s6, %s807_s6, %s808_s7  }
  0x4d   : > { %p1112_p3 = scmp.ne.s32.totalorder %s1106_s21, 0 }
  0x4e   : > { %s989_s16 = sand.u32 (!%p1112_p3), 1, %s788_s10   ;;  %p1113_p7 = scmp.ne.s32.totalorder (!%p1112_p3), %s1104_s19, 0 }
  0x4f   : > { %164 = sbr.rel (%p1112_p3) target bundleno = 455 (0x1c7), region = 28  ;;  %s508_s27 = sshll.u32 (!%p1112_p3), %s989_s16, 7 }
  0x50   : > { %s167_s22 = scalar_lea.sflag (!%p1112_p3), [#allocation3], %s989_s16  ;;  %s993_s29 = scalar_lea.vmem (!%p1112_p3), [#allocation2], %s508_s27 }
  0x56   : > { %771 = dma.done.wait (%p1113_p7), %s167_s22, 2048  }
  0x57   : > { %773 = vsyncadd (%p1113_p7), %s167_s22, 4294965248  ;;  %p1114_p13 = scmp.ne.s32.totalorder %s1102_s17, 0 }
  0x59   : > { %775 = dma.done.wait (%p1114_p13), [#allocation6], 1024  }
  0x5a   : > { %777 = vsyncadd (%p1114_p13), [#allocation6], 4294966272  ;;  %v202_v0 = vld [vmem:[%s993_s29 + $0x28] sm:$0xff]  ;;  %v201_v1 = vld [vmem:[%s993_s29 + $0x20] sm:$0xff]  ;;  %s810_s21 = smov 16   ;;  %s811_s17 = smov 32  }
  0x5b   : > { %219 = vrot.lane.b32.xlu1 %v202_v0, %s810_s21  ;;  %217 = vrot.lane.b32.xlu0 %v201_v1, %s810_s21  ;;  %v204_v2 = vld [vmem:[%s993_s29 + $0x38] sm:$0xff]  ;;  %v203_v3 = vld [vmem:[%s993_s29 + $0x30] sm:$0xff]  ;;  %v276_v4 = vld [vmem:[#allocation5] sm:$0xff]  ;;  %s812_s19 = smov 48   ;;  %vm261_vm0 = vcmask 130048   ;;  %vm266_vm1 = vcmask 261120  }
  0x5c   : > { %v207_v5 = vld [vmem:[%s993_s29 + $0x50] sm:$0xff]  ;;  %v277_v6 = vld [vmem:[#allocation5 + $0x8] sm:$0xff]  ;;  %v205_v7 = vld [vmem:[%s993_s29 + $0x40] sm:$0xff]  ;;  %vm271_vm2 = vcmask 392192   ;;  %vm284_vm3 = vcmask 523264   ;;  %s510_s6 = sshll.u32 %s989_s16, 5 }
  0x5d   : > { %v556_v8 = vpack.c.bf16 %v277_v6, %v276_v4  ;;  %v278_v9 = vld [vmem:[#allocation5 + $0x10] sm:$0xff]  ;;  %v279_v10 = vld [vmem:[#allocation5 + $0x18] sm:$0xff]  ;;  %v280_v12 = vld [vmem:[#allocation5 + $0x20] sm:$0xff]  ;;  %s194_s7 = scalar_lea.vmem [#allocation7], %s510_s6  ;;  %s521_s5 = sshll.u32 %s796_s12, 9 }
  0x5e   : > { %v560_v11 = vpack.c.bf16 %v279_v10, %v278_v9  ;;  %v281_v13 = vld [vmem:[#allocation5 + $0x28] sm:$0xff]  ;;  %v208_v14 = vld [vmem:[%s993_s29 + $0x58] sm:$0xff]  ;;  %v282_v17 = vld [vmem:[#allocation5 + $0x30] sm:$0xff]  ;;  %s402_s4 = sshll.u32 %s194_s7, 4  ;;  %s1042_s30 = scalar_lea.hbm %s1097_s2, %s521_s5  ;;  %s1037_s4 = int_to_ptr.vmem [resolvable:$true] %s402_s4 }
  0x5f   : > { %223 = vrot.lane.b32.xlu1 %v204_v2, %s810_s21  ;;  %221 = vrot.lane.b32.xlu0 %v203_v3, %s810_s21  ;;  %v206_v15 = vld [vmem:[%s993_s29 + $0x48] sm:$0xff]  ;;  %v564_v16 = vpack.c.bf16 %v281_v13, %v280_v12  ;;  %v283_v18 = vld [vmem:[#allocation5 + $0x38] sm:$0xff]  ;;  %v211_v19 = vld [vmem:[%s993_s29 + $0x70] sm:$0xff]  ;;  %s387_s12 = scalar_lea.sflag [#allocation4], %s989_s16  ;;  %s718_s23 = scalar_lea.vmem %s1037_s4, 512 }
  0x60   : > { %557 = vmatprep.subr.bf16.mxu0 %v556_v8  ;;  %572 = vmatprep.subr.bf16.mxu1 %v556_v8  ;;  %v209_v20 = vld [vmem:[%s993_s29 + $0x60] sm:$0xff]  ;;  %v568_v21 = vpack.c.bf16 %v283_v18, %v282_v17  ;;  %v212_v22 = vld [vmem:[%s993_s29 + $0x78] sm:$0xff]  ;;  %v210_v23 = vld [vmem:[%s993_s29 + $0x68] sm:$0xff]  ;;  %p719_p4 = scmp.ne.s32.totalorder %s1037_s4, %s718_s23  ;;  %s813_s3 = smov [#allocation7]  }
  0x61   : > { %559 = vmatpush3.bf16.msra.mxu0 %v556_v8  ;;  %576 = vmatpush3.bf16.msra.mxu1 %v556_v8  ;;  %v197_v30 = vld [vmem:[%s993_s29] sm:$0xff]  ;;  %v199_v31 = vld [vmem:[%s993_s29 + $0x10] sm:$0xff]  ;;  %v198_v36 = vld [vmem:[%s993_s29 + $0x8] sm:$0xff]  ;;  %s722_s18 = sshll.u32 %s813_s3, 4  ;;  %s723_s18 = int_to_ptr.vmem [resolvable:$false] %s722_s18 }
  0x62   : > { %561 = vmatprep.subr.bf16.mxu0 %v560_v11  ;;  %573 = vmatprep.subr.bf16.mxu1 %v560_v11  ;;  %v200_v37 = vld [vmem:[%s993_s29 + $0x18] sm:$0xff]  ;;  %p720_p6 = pnand %p719_p4, %p930_p10  ;;  %s724_s26 = scalar_lea.vmem %s723_s18, 1024 }
  0x63   : > { %237 = vrot.lane.b32.xlu1 %v207_v5, %s811_s17  ;;  %233 = vrot.lane.b32.xlu0 %v205_v7, %s811_s17  ;;  %p725_p12 = scmp.lt.s32.totalorder %s1037_s4, %s723_s18  ;;  %p726_p11 = scmp.lt.s32.totalorder %s724_s26, %s718_s23 }
  0x64   : > { %p721_p8 = pneg %p720_p6 }
  0x65   : > { %563 = vmatpush3.bf16.msra.mxu0 %v560_v11  ;;  %577 = vmatpush3.bf16.msra.mxu1 %v560_v11  ;;  %p727_p0 = por %p726_p11, %p725_p12 }
  0x66   : > { %565 = vmatprep.subr.bf16.mxu0 %v564_v16  ;;  %574 = vmatprep.subr.bf16.mxu1 %v564_v16 }
  0x67   : > { %239 = vrot.lane.b32.xlu1 %v208_v14, %s811_s17  ;;  %235 = vrot.lane.b32.xlu0 %v206_v15, %s811_s17  ;;  %p728_p5 = pnand %p727_p0, %p721_p8 }
  0x69   : > { %567 = vmatpush3.bf16.msra.mxu0 %v564_v16  ;;  %578 = vmatpush3.bf16.msra.mxu1 %v564_v16 }
  0x6a   : > { %569 = vmatprep.subr.bf16.mxu0 %v568_v21  ;;  %575 = vmatprep.subr.bf16.mxu1 %v568_v21 }
  0x6b   : > { %253 = vrot.lane.b32.xlu1 %v211_v19, %s812_s19  ;;  %249 = vrot.lane.b32.xlu0 %v209_v20, %s812_s19 }
  0x6d   : > { %571 = vmatpush3.bf16.msra.mxu0 %v568_v21  ;;  %579 = vmatpush3.bf16.msra.mxu1 %v568_v21 }
  0x6f   : > { %255 = vrot.lane.b32.xlu1 %v212_v22, %s812_s19  ;;  %251 = vrot.lane.b32.xlu0 %v210_v23, %s812_s19 }
  0xcd   : > { %v220_v24 = vpop.permute.xlu1 %219  ;;  %v218_v25 = vpop.permute.xlu0 %217 }
  0xce   : > { %v262_v34 = vsel %vm261_vm0, %v197_v30, %v218_v25  ;;  %v263_v44 = vsel %vm261_vm0, %v198_v36, %v220_v24 }
  0xd1   : > { %v224_v26 = vpop.permute.xlu1 %223  ;;  %v222_v27 = vpop.permute.xlu0 %221 }
  0xd2   : > { %v264_v35 = vsel %vm261_vm0, %v199_v31, %v222_v27  ;;  %v265_v45 = vsel %vm261_vm0, %v200_v37, %v224_v26 }
  0xd5   : > { %v238_v28 = vpop.permute.xlu1 %237  ;;  %v234_v29 = vpop.permute.xlu0 %233 }
  0xd6   : > { %v269_v38 = vsel %vm266_vm1, %v264_v35, %v238_v28  ;;  %v267_v39 = vsel %vm266_vm1, %v262_v34, %v234_v29 }
  0xd9   : > { %v240_v32 = vpop.permute.xlu1 %239  ;;  %v236_v33 = vpop.permute.xlu0 %235 }
  0xda   : > { %v270_v46 = vsel %vm266_vm1, %v265_v45, %v240_v32  ;;  %v268_v47 = vsel %vm266_vm1, %v263_v44, %v236_v33 }
  0xdd   : > { %v254_v40 = vpop.permute.xlu1 %253  ;;  %v250_v41 = vpop.permute.xlu0 %249 }
  0xde   : > { %v272_v42 = vsel %vm271_vm2, %v267_v39, %v250_v41  ;;  %v274_v43 = vsel %vm271_vm2, %v269_v38, %v254_v40 }
  0xdf   : > { %550 = vmatprep.mubr.msk.f32.mxu0 %vm284_vm3, %v272_v42  ;;  %553 = vmatprep.mubr.msk.f32.mxu1 %vm284_vm3, %v274_v43 }
  0xe1   : > { %v256_v48 = vpop.permute.xlu1 %255  ;;  %v252_v49 = vpop.permute.xlu0 %251 }
  0xe2   : > { %v275_v50 = vsel %vm271_vm2, %v270_v46, %v256_v48  ;;  %v273_v51 = vsel %vm271_vm2, %v268_v47, %v252_v49 }
  0xe3   : > { %551 = vmatmul.mubr.msk.f32.vlgmr.msra.gmra.mrb[0].mxu0 %vm284_vm3, %v273_v51  ;;  %554 = vmatmul.mubr.msk.f32.vlgmr.msra.gmra.mrb[0].mxu1 %vm284_vm3, %v275_v50 }
 0x1b6   : > { %v552_v52 = vpop.f32.mrb[0].mxu0  ;;  %v555_v53 = vpop.f32.mrb[0].mxu1 }
 0x1b7   : > { %383 = vst.msk [vmem:[%s194_s7 + $0x8] sm:$0xff] %vm284_vm3, %v552_v52  ;;  %385 = vst.msk [vmem:[%s194_s7 + $0x18] sm:$0xff] %vm284_vm3, %v555_v53  ;;  %v363_v54 = vpop.f32.mrb[1].mxu0  ;;  %v373_v55 = vpop.f32.mrb[1].mxu1 }
 0x1b8   : > { %382 = vst.msk [vmem:[%s194_s7] sm:$0xff] %vm284_vm3, %v363_v54  ;;  %384 = vst.msk [vmem:[%s194_s7 + $0x10] sm:$0xff] %vm284_vm3, %v373_v55 }
 0x1b9   : > { %731 = shalt.err (!%p728_p5)
}
 0x1ba   : > { %s732_s27 = scalar_lea.hbm %s1042_s30, 512  ;;  %s736_s21 = scalar_lea.hbm %s1097_s2, 1024 }
 0x1bb   : > { %p733_p9 = scmp.ne.s32.totalorder %s1042_s30, %s732_s27  ;;  %p737_p3 = scmp.lt.u32.totalorder %s1042_s30, %s1097_s2 }
 0x1bc   : > { %p738_p7 = scmp.lt.u32.totalorder %s736_s21, %s732_s27  ;;  %p740_p4 = scmp.lt.u32.totalorder %s732_s27, %s1042_s30 }
 0x1bd   : > { %p734_p1 = pnand %p733_p9, %p930_p10 }
 0x1be   : > { %p739_p13 = por %p738_p7, %p737_p3 }
 0x1bf   : > { %p735_p2 = pneg %p734_p1 }
 0x1c0   : > { %p741_p6 = por %p740_p4, %p739_p13 }
 0x1c2   : > { %p742_p8 = pnand %p741_p6, %p735_p2 }
 0x1c4   : > { %745 = shalt.err (!%p742_p8)
}
 0x1c5   : > { %s814_s6 = smov 128   ;;  %s815_s7 = smov 8  }
 0x1c6   : > { %586 = dma.vmem_to_hbm [thread:$0]  (%p930_p10), %s1037_s4, 512, %s1042_s30, %s387_s12, %s814_s6, %s814_s6, %s815_s7  }
 0x1c7 PF: > { %s417_s5 = sand.u32 1, %s784_s9   ;;  %p1115_p12 = scmp.ne.s32.totalorder %s1105_s20, 0 }
 0x1c8   : > { %p1116_p11 = scmp.ge.s32.totalorder %s804_s14, 2  ;;  %s418_s8 = scalar_lea.sflag [#allocation4], %s417_s5 }
 0x1ca   : > { %p597_p0 = pnand %p1116_p11, %p1115_p12 }
 0x1cc   : > { %779 = dma.done.wait (!%p597_p0), %s418_s8, 512  }
 0x1cd   : > { %781 = vsyncadd (!%p597_p0), %s418_s8, 4294966784  ;;  %s19_s14 = sadd.s32 1, %s804_s14   ;;  %s1117_s9 = smov %s788_s10 }
 0x1ce   : > { %p16_p5 = scmp.ge.s32.totalorder %s19_s14, 4   ;;  %s1118_s10 = smov %s792_s11 }
 0x1cf   : > { %s1119_s11 = smov %s939_s28  ;;  %s1120_s12 = smov %s800_s13 }
 0x1d0   : > { %s1121_s13 = smov %s1123_s25  ;;  %18 = sbr.rel (!%p16_p5) target bundleno = 7 (0x7), region = 77 }
 0x1d7   :  { %423 = vsyncpa [#allocation3], 1 }
 0x1d8   :  { %425 = vsyncpa [#allocation3 + $0x1], 1 }
 0x1d9   :  { %426 = vsyncpa [#allocation6], 1 }
 0x1da   :  { %427 = vsyncpa [#allocation4], 1 }
 0x1db   :  { %429 = vsyncpa [#allocation4 + $0x1], 1 }

</bundles_post_ra>
